<compile_context>
chip_gen: v7x
topology: tpu7x:2x2x1
jax: 0.10.0
libtpu: 0.0.40
codegen_flags: <defaults>
</compile_context>

<pallas_src>
import jax
import jax.numpy as jnp
from jax.experimental import pallas as pl
from jax.experimental.pallas import tpu as pltpu

_LANE = 128
_SUBLANE = 8
_TILE_QUANTUM = _LANE * _SUBLANE  # 1024 batch elems == one dense (8, 128) f32 slab


def simplenet_kernel(w1_ref, b1_ref, w2_ref, b2_ref, x_ref, o_ref):
    # x_ref: (2, rows, 128) f32 — batch packed densely over (sublane, lane).
    # Params are 13 scalars in SMEM; both contractions unrolled onto the VPU.
    x0 = x_ref[0]                                   # (rows, 128)
    x1 = x_ref[1]                                   # (rows, 128)

    # fc1 + ReLU. w1 is flattened row-major from (in=2, out=3): w1_flat[i*3+j] = w1[i, j].
    h0 = jnp.maximum(x0 * w1_ref[0] + x1 * w1_ref[3] + b1_ref[0], 0.0)
    h1 = jnp.maximum(x0 * w1_ref[1] + x1 * w1_ref[4] + b1_ref[1], 0.0)
    h2 = jnp.maximum(x0 * w1_ref[2] + x1 * w1_ref[5] + b1_ref[2], 0.0)

    # fc2, unrolled over the 3 hidden units.
    y = h0 * w2_ref[0] + h1 * w2_ref[1] + h2 * w2_ref[2] + b2_ref[0]
    o_ref[...] = y.astype(o_ref.dtype)              # (rows, 128) dense store


def _choose_tiling(batch, max_tile_b):
    """Pick (tile_b, padded_b, n_steps): lane/sublane-dense, adaptive, >=2 steps when possible."""
    padded_min = pl.cdiv(batch, _TILE_QUANTUM) * _TILE_QUANTUM
    n_steps = pl.cdiv(padded_min, max_tile_b)
    if n_steps < 2 and padded_min >= 2 * _TILE_QUANTUM:
        n_steps = 2  # lets the "parallel" batch axis shard across both v7x TensorCores
    tile_b = pl.cdiv(pl.cdiv(padded_min, n_steps), _TILE_QUANTUM) * _TILE_QUANTUM
    return tile_b, tile_b * n_steps, n_steps


def simplenet_forward_feature_major(xt, w1, b1, w2, b2, *, max_tile_b=128 * 1024):
    """xt: (2, B) f32 feature-major input (no transpose pass needed).
    Weights stored as (in, out): w1 (2,3), b1 (1,3), w2 (3,1), b2 (1,1). Returns (B, 1)."""
    B = xt.shape[1]
    if B == 0:
        return jnp.zeros((0, 1), jnp.float32)

    tile_b, padded_b, n_steps = _choose_tiling(B, max_tile_b)
    rows_tile = tile_b // _LANE      # multiple of 8 -> satisfies the (8, 128) block rule
    rows_total = padded_b // _LANE

    # Dense slabs: (2, rows_total, 128); padded lanes produce relu(b1)@w2+b2 and are sliced off.
    x3 = jnp.pad(xt.astype(jnp.float32), ((0, 0), (0, padded_b - B)))
    x3 = x3.reshape(2, rows_total, _LANE)

    # Flatten params to small 1-D SMEM scalar tables.
    w1_flat = w1.reshape(-1).astype(jnp.float32)   # (6,)  row-major (in, out)
    b1_flat = b1.reshape(-1).astype(jnp.float32)   # (3,)
    w2_flat = w2.reshape(-1).astype(jnp.float32)   # (3,)
    b2_flat = b2.reshape(-1).astype(jnp.float32)   # (1,)

    smem = pl.BlockSpec(memory_space=pltpu.MemorySpace.SMEM)

    out = pl.pallas_call(
        simplenet_kernel,
        out_shape=jax.ShapeDtypeStruct((rows_total, _LANE), jnp.float32),
        grid=(n_steps,),
        in_specs=[
            smem,                                                    # w1_flat
            smem,                                                    # b1_flat
            smem,                                                    # w2_flat
            smem,                                                    # b2_flat
            pl.BlockSpec((2, rows_tile, _LANE), lambda i: (0, i, 0)),  # x slab
        ],
        out_specs=pl.BlockSpec((rows_tile, _LANE), lambda i: (i, 0)),  # y slab
        compiler_params=pltpu.CompilerParams(
            dimension_semantics=("parallel",),    # batch axis: pipeline + shard across TCs
            vmem_limit_bytes=32 * 1024 * 1024,    # safe on v5e/v6e/v7x; working set is ~3 MiB
        ),
    )(w1_flat, b1_flat, w2_flat, b2_flat, x3)

    # Back to the PyTorch layout (B, 1).
    return out.reshape(-1)[:B][:, None]


def simplenet_forward(x, w1, b1, w2, b2, *, max_tile_b=128 * 1024):
    """x: (B, 2) batch-major (PyTorch layout)."""
    # TODO(synk): x.T is one extra HBM pass; producers that can emit (2, B)
    # feature-major data should call simplenet_forward_feature_major directly.
    return simplenet_forward_feature_major(x.T, w1, b1, w2, b2, max_tile_b=max_tile_b)


def init_params(key):
    # Deterministic init mirroring PyTorch Linear default: U(-1/sqrt(fan_in), 1/sqrt(fan_in)).
    k1, k2, k3, k4 = jax.random.split(key, 4)
    bound1 = 1.0 / jnp.sqrt(2.0)
    bound2 = 1.0 / jnp.sqrt(3.0)
    # Stored as (in_features, out_features) — transposed relative to PyTorch's (out, in).
    w1 = jax.random.uniform(k1, (2, 3), jnp.float32, -bound1, bound1)
    b1 = jax.random.uniform(k2, (1, 3), jnp.float32, -bound1, bound1)
    w2 = jax.random.uniform(k3, (3, 1), jnp.float32, -bound2, bound2)
    b2 = jax.random.uniform(k4, (1, 1), jnp.float32, -bound2, bound2)
    return w1, b1, w2, b2


if __name__ == "__main__":
    key = jax.random.PRNGKey(0)
    kx, kx2, kp = jax.random.split(key, 3)
    w1, b1, w2, b2 = init_params(kp)

    def reference(x):
        return jnp.maximum(x @ w1 + b1, 0.0) @ w2 + b2

    # Small batch (single grid step).
    B = 8
    x = jax.random.normal(kx, (B, 2), jnp.float32)
    out = jax.block_until_ready(simplenet_forward(x, w1, b1, w2, b2))
    assert out.shape == (B, 1)
    assert jnp.allclose(out, reference(x), atol=1e-5), "mismatch vs reference (B=8)"

    # Non-multiple batch that exercises the >=2-step grid (v7x dual-TC path) + padding slice.
    B2 = 3000
    x2 = jax.random.normal(kx2, (B2, 2), jnp.float32)
    out2 = jax.block_until_ready(simplenet_forward(x2, w1, b1, w2, b2))
    assert out2.shape == (B2, 1)
    assert jnp.allclose(out2, reference(x2), atol=1e-5), "mismatch vs reference (B=3000)"

    print("KERNEL_OK")
</pallas_src>

<mosaic_0001>
module attributes {stable_mosaic.version = 11 : i64} {
  func.func @simplenet_kernel(%arg0: i32, %arg1: memref<6xf32, #tpu.memory_space<smem>>, %arg2: memref<3xf32, #tpu.memory_space<smem>>, %arg3: memref<3xf32, #tpu.memory_space<smem>>, %arg4: memref<1xf32, #tpu.memory_space<smem>>, %arg5: memref<2x8x128xf32, #tpu.memory_space<vmem>>, %arg6: memref<8x128xf32, #tpu.memory_space<vmem>>) attributes {dimension_semantics = [#tpu.dimension_semantics<parallel>], iteration_bounds = array<i64: 1>, scalar_prefetch = 0 : i64, scratch_operands = 0 : i64, tpu.core_type = #tpu.core_type<tc>, window_params = [{transform_indices = @transform_0, window_bounds = array<i64: 6>}, {transform_indices = @transform_1, window_bounds = array<i64: 3>}, {transform_indices = @transform_2, window_bounds = array<i64: 3>}, {transform_indices = @transform_3, window_bounds = array<i64: 1>}, {transform_indices = @transform_4, window_bounds = array<i64: 2, 8, 128>}, {transform_indices = @transform_5, window_bounds = array<i64: 8, 128>}]} {
    %c0 = arith.constant 0 : index
    %c0_0 = arith.constant 0 : index
    %c0_1 = arith.constant 0 : index
    %0 = vector.load %arg5[%c0, %c0_0, %c0_1] : memref<2x8x128xf32, #tpu.memory_space<vmem>>, vector<1x8x128xf32>
    %1 = vector.shape_cast %0 : vector<1x8x128xf32> to vector<8x128xf32>
    %c1 = arith.constant 1 : index
    %c0_2 = arith.constant 0 : index
    %c0_3 = arith.constant 0 : index
    %2 = vector.load %arg5[%c1, %c0_2, %c0_3] : memref<2x8x128xf32, #tpu.memory_space<vmem>>, vector<1x8x128xf32>
    %3 = vector.shape_cast %2 : vector<1x8x128xf32> to vector<8x128xf32>
    %c0_4 = arith.constant 0 : index
    %4 = memref.load %arg1[%c0_4] : memref<6xf32, #tpu.memory_space<smem>>
    %5 = vector.broadcast %4 : f32 to vector<8x128xf32>
    %6 = arith.mulf %1, %5 : vector<8x128xf32>
    %c3 = arith.constant 3 : index
    %7 = memref.load %arg1[%c3] : memref<6xf32, #tpu.memory_space<smem>>
    %8 = vector.broadcast %7 : f32 to vector<8x128xf32>
    %9 = arith.mulf %3, %8 : vector<8x128xf32>
    %10 = arith.addf %6, %9 : vector<8x128xf32>
    %c0_5 = arith.constant 0 : index
    %11 = memref.load %arg2[%c0_5] : memref<3xf32, #tpu.memory_space<smem>>
    %12 = vector.broadcast %11 : f32 to vector<8x128xf32>
    %13 = arith.addf %10, %12 : vector<8x128xf32>
    %cst = arith.constant 0.000000e+00 : f32
    %14 = vector.broadcast %cst : f32 to vector<8x128xf32>
    %15 = arith.maximumf %13, %14 : vector<8x128xf32>
    %c1_6 = arith.constant 1 : index
    %16 = memref.load %arg1[%c1_6] : memref<6xf32, #tpu.memory_space<smem>>
    %17 = vector.broadcast %16 : f32 to vector<8x128xf32>
    %18 = arith.mulf %1, %17 : vector<8x128xf32>
    %c4 = arith.constant 4 : index
    %19 = memref.load %arg1[%c4] : memref<6xf32, #tpu.memory_space<smem>>
    %20 = vector.broadcast %19 : f32 to vector<8x128xf32>
    %21 = arith.mulf %3, %20 : vector<8x128xf32>
    %22 = arith.addf %18, %21 : vector<8x128xf32>
    %c1_7 = arith.constant 1 : index
    %23 = memref.load %arg2[%c1_7] : memref<3xf32, #tpu.memory_space<smem>>
    %24 = vector.broadcast %23 : f32 to vector<8x128xf32>
    %25 = arith.addf %22, %24 : vector<8x128xf32>
    %cst_8 = arith.constant 0.000000e+00 : f32
    %26 = vector.broadcast %cst_8 : f32 to vector<8x128xf32>
    %27 = arith.maximumf %25, %26 : vector<8x128xf32>
    %c2 = arith.constant 2 : index
    %28 = memref.load %arg1[%c2] : memref<6xf32, #tpu.memory_space<smem>>
    %29 = vector.broadcast %28 : f32 to vector<8x128xf32>
    %30 = arith.mulf %1, %29 : vector<8x128xf32>
    %c5 = arith.constant 5 : index
    %31 = memref.load %arg1[%c5] : memref<6xf32, #tpu.memory_space<smem>>
    %32 = vector.broadcast %31 : f32 to vector<8x128xf32>
    %33 = arith.mulf %3, %32 : vector<8x128xf32>
    %34 = arith.addf %30, %33 : vector<8x128xf32>
    %c2_9 = arith.constant 2 : index
    %35 = memref.load %arg2[%c2_9] : memref<3xf32, #tpu.memory_space<smem>>
    %36 = vector.broadcast %35 : f32 to vector<8x128xf32>
    %37 = arith.addf %34, %36 : vector<8x128xf32>
    %cst_10 = arith.constant 0.000000e+00 : f32
    %38 = vector.broadcast %cst_10 : f32 to vector<8x128xf32>
    %39 = arith.maximumf %37, %38 : vector<8x128xf32>
    %c0_11 = arith.constant 0 : index
    %40 = memref.load %arg3[%c0_11] : memref<3xf32, #tpu.memory_space<smem>>
    %41 = vector.broadcast %40 : f32 to vector<8x128xf32>
    %42 = arith.mulf %15, %41 : vector<8x128xf32>
    %c1_12 = arith.constant 1 : index
    %43 = memref.load %arg3[%c1_12] : memref<3xf32, #tpu.memory_space<smem>>
    %44 = vector.broadcast %43 : f32 to vector<8x128xf32>
    %45 = arith.mulf %27, %44 : vector<8x128xf32>
    %46 = arith.addf %42, %45 : vector<8x128xf32>
    %c2_13 = arith.constant 2 : index
    %47 = memref.load %arg3[%c2_13] : memref<3xf32, #tpu.memory_space<smem>>
    %48 = vector.broadcast %47 : f32 to vector<8x128xf32>
    %49 = arith.mulf %39, %48 : vector<8x128xf32>
    %50 = arith.addf %46, %49 : vector<8x128xf32>
    %c0_14 = arith.constant 0 : index
    %51 = memref.load %arg4[%c0_14] : memref<1xf32, #tpu.memory_space<smem>>
    %52 = vector.broadcast %51 : f32 to vector<8x128xf32>
    %53 = arith.addf %50, %52 : vector<8x128xf32>
    %c0_15 = arith.constant 0 : index
    %c0_16 = arith.constant 0 : index
    %54 = vector.load %arg6[%c0_15, %c0_16] : memref<8x128xf32, #tpu.memory_space<vmem>>, vector<8x128xf32>
    tpu.vector_store %arg6[%c0_15, %c0_16], %53 {strides = array<i32>} : memref<8x128xf32, #tpu.memory_space<vmem>>, vector<8x128xf32>,
    return
  }
  func.func @transform_0(%arg0: i32) -> i32 {
    %c0_i32 = arith.constant 0 : i32
    %c0_i32_0 = arith.constant 0 : i32
    return %c0_i32 : i32
  }
  func.func @transform_1(%arg0: i32) -> i32 {
    %c0_i32 = arith.constant 0 : i32
    %c0_i32_0 = arith.constant 0 : i32
    return %c0_i32 : i32
  }
  func.func @transform_2(%arg0: i32) -> i32 {
    %c0_i32 = arith.constant 0 : i32
    %c0_i32_0 = arith.constant 0 : i32
    return %c0_i32 : i32
  }
  func.func @transform_3(%arg0: i32) -> i32 {
    %c0_i32 = arith.constant 0 : i32
    %c0_i32_0 = arith.constant 0 : i32
    return %c0_i32 : i32
  }
  func.func @transform_4(%arg0: i32) -> (i32, i32, i32) {
    %c0_i32 = arith.constant 0 : i32
    %c0_i32_0 = arith.constant 0 : i32
    %c0_i32_1 = arith.constant 0 : i32
    return %c0_i32, %arg0, %c0_i32_0 : i32, i32, i32
  }
  func.func @transform_5(%arg0: i32) -> (i32, i32) {
    %c0_i32 = arith.constant 0 : i32
    %c0_i32_0 = arith.constant 0 : i32
    return %arg0, %c0_i32 : i32, i32
  }
}

</mosaic_0001>

<bundles_post_ra>
// kernel: tpu_custom_call.1
= control target key start
LH: loop header
LB: loop body
LE: loop exit
PB: predicated region body
PF: predicated region fallthrough
CT: control target
= control target key end

     0   :  { %11 = vsyncpa [#allocation6], 0  ;;  %s317_s0 = inlined_call_operand.vmem [shape: f32[6], index: 0, kind: input, shape index: {}]   ;;  %s318_s1 = inlined_call_operand.vmem [shape: f32[3], index: 1, kind: input, shape index: {}]   ;;  %s319_s2 = inlined_call_operand.vmem [shape: f32[3], index: 2, kind: input, shape index: {}]   ;;  %s320_s3 = inlined_call_operand.<no memory space> [shape: f32[1], index: 3, kind: input, shape index: {}]   ;;  %s321_s4 = inlined_call_operand.hbm [shape: f32[2,8,128], index: 4, kind: input, shape index: {}]   ;;  %s322_s5 = inlined_call_operand.hbm [shape: f32[8,128], index: 5, kind: output, shape index: {}]  }
   0x1   :  { %12 = vsyncpa [#allocation8], 0 }
   0x2   :  { %13 = vsyncpa [#allocation4], 0  ;;  %s31_s20 = sshll.u32 %s318_s1, 4  ;;  %s32_s20 = int_to_ptr.vmem [resolvable:$true] %s31_s20 }
   0x3   :  { %14 = vsyncpa [#allocation5], 0  ;;  %s21_s23 = sshll.u32 %s317_s0, 4  ;;  %s156_s24 = scalar_lea.vmem %s32_s20, 16  ;;  %s22_s23 = int_to_ptr.vmem [resolvable:$true] %s21_s23 }
   0x4   :  { %p157_p0 = scmp.ne.s32.totalorder %s32_s20, %s156_s24  ;;  %p161_p1 = scmp.lt.s32.totalorder %s32_s20, %s32_s20 }
   0x5   :  { %p162_p2 = scmp.lt.s32.totalorder %s156_s24, %s156_s24 }
   0x7   :  { %p163_p3 = por %p162_p2, %p161_p1 }
   0x9   :  { %p164_p4 = pnand %p163_p3, %p157_p0 }
   0xb   :  { %167 = shalt.err (!%p164_p4)
}
   0xc   :  { %s244_s25 = smov [#allocation7]   ;;  %s168_s26 = scalar_lea.vmem %s22_s23, 16 }
   0xd   :  { %34 = dma.vmem_to_smem %s32_s20, 16, %s244_s25, [#allocation8]  }
   0xe   :  { %p169_p5 = scmp.ne.s32.totalorder %s22_s23, %s168_s26  ;;  %p173_p6 = scmp.lt.s32.totalorder %s22_s23, %s22_s23 }
   0xf   :  { %p174_p7 = scmp.lt.s32.totalorder %s168_s26, %s168_s26 }
  0x11   :  { %p175_p8 = por %p174_p7, %p173_p6 }
  0x13   :  { %p176_p9 = pnand %p175_p8, %p169_p5 }
  0x15   :  { %179 = shalt.err (!%p176_p9)
}
  0x16   :  { %s245_s1 = smov [#allocation3]   ;;  %s41_s28 = sshll.u32 %s319_s2, 4  ;;  %s42_s28 = int_to_ptr.vmem [resolvable:$true] %s41_s28 }
  0x17   :  { %24 = dma.vmem_to_smem %s22_s23, 16, %s245_s1, [#allocation6]  }
  0x18   :  { %s180_s29 = scalar_lea.vmem %s42_s28, 16  ;;  %p185_p11 = scmp.lt.s32.totalorder %s42_s28, %s42_s28 }
  0x19   :  { %p181_p10 = scmp.ne.s32.totalorder %s42_s28, %s180_s29  ;;  %p186_p12 = scmp.lt.s32.totalorder %s180_s29, %s180_s29 }
  0x1b   :  { %p187_p13 = por %p186_p12, %p185_p11 }
  0x1d   :  { %p188_p0 = pnand %p187_p13, %p181_p10 }
  0x1f   :  { %191 = shalt.err (!%p188_p0)
}
  0x20   :  { %s246_s30 = smov [#allocation9]   ;;  %s247_s6 = smov [#allocation10]  }
  0x21   :  { %44 = dma.vmem_to_smem %s42_s28, 16, %s246_s30, [#allocation8]  }
  0x22   :  { %s52_s7 = sshll.u32 %s247_s6, 4  ;;  %s192_s10 = scalar_lea.hbm %s321_s4, 256  ;;  %s53_s7 = int_to_ptr.vmem [resolvable:$true] %s52_s7 }
  0x23   :  { %p193_p1 = scmp.ne.s32.totalorder %s321_s4, %s192_s10  ;;  %p196_p2 = scmp.lt.u32.totalorder %s192_s10, %s321_s4 }
  0x25   :  { %p198_p3 = pnand %p196_p2, %p193_p1 }
  0x27   :  { %201 = shalt.err (!%p198_p3)
}
  0x28   :  { %s202_s14 = scalar_lea.vmem %s53_s7, 256  ;;  %p207_p5 = scmp.lt.s32.totalorder %s53_s7, %s53_s7 }
  0x29   :  { %p203_p4 = scmp.ne.s32.totalorder %s53_s7, %s202_s14  ;;  %p208_p6 = scmp.lt.s32.totalorder %s202_s14, %s202_s14 }
  0x2b   :  { %p209_p7 = por %p208_p6, %p207_p5 }
  0x2d   :  { %p210_p8 = pnand %p209_p7, %p203_p4 }
  0x2f   :  { %213 = shalt.err (!%p210_p8)
}
  0x30   :  { %s248_s15 = smov 128   ;;  %s249_s16 = smov 8  }
  0x31   :  { %58 = dma.hbm_to_vmem [thread:$0]  %s321_s4, 256, %s53_s7, [#allocation4], %s248_s15, %s248_s15, %s249_s16  }
  0x32   :  { %236 = dma.done.wait [#allocation6], 16  }
  0x33   :  { %237 = vsyncadd [#allocation6], 4294967280 }
  0x34   :  { %238 = dma.done.wait [#allocation8], 32  }
  0x35   :  { %239 = vsyncadd [#allocation8], 4294967264 }
  0x36   :  { %240 = dma.done.wait [#allocation4], 256  }
  0x37   :  { %241 = vsyncadd [#allocation4], 4294967040 }
  0x38   :  { %71 = sfence }
  0x39   :  { %s75_s19 = sld [smem:[#allocation3]]  ;;  %s140_s20 = sld [smem:[#allocation3 + $0x3]]  ;;  %v72_v0 = vld [vmem:[#allocation10] sm:$0xff]  ;;  %v74_v1 = vld [vmem:[#allocation10 + $0x8] sm:$0xff]  ;;  %v120_v33 = vstv %s320_s3 }
  0x3a   :  { %s82_s21 = sld [smem:[#allocation7]]  ;;  %s141_s22 = sld [smem:[#allocation3 + $0x1]] }
  0x3b   :  { %s142_s23 = sld [smem:[#allocation3 + $0x4]]  ;;  %s143_s24 = sld [smem:[#allocation7 + $0x1]] }
  0x3c   :  { %s144_s25 = sld [smem:[#allocation3 + $0x2]]  ;;  %s145_s26 = sld [smem:[#allocation3 + $0x5]] }
  0x3d   :  { %s146_s1 = sld [smem:[#allocation7 + $0x2]]  ;;  %s108_s0 = sld [smem:[#allocation9]] }
  0x3e   :  { %s147_s4 = sld [smem:[#allocation9 + $0x1]]  ;;  %s148_s27 = sld [smem:[#allocation9 + $0x2]] }
  0x3f   :  { %v76_v2 = vstv %s75_s19  ;;  %v79_v3 = vstv %s140_s20  ;;  %s250_s30 = smov [#allocation11]  }
  0x40   :  { %v77_v4 = vmul.f32 %v76_v2, %v72_v0  ;;  %v80_v5 = vmul.f32 %v79_v3, %v74_v1  ;;  %v87_v6 = vstv %s141_s22  ;;  %v83_v7 = vstv %s82_s21  ;;  %s129_s6 = sshll.u32 %s250_s30, 4  ;;  %s130_s6 = int_to_ptr.vmem [resolvable:$true] %s129_s6 }
  0x41   :  { %v88_v8 = vmul.f32 %v87_v6, %v72_v0  ;;  %v90_v9 = vstv %s142_s23  ;;  %v94_v14 = vstv %s143_s24  ;;  %s214_s7 = scalar_lea.vmem %s130_s6, 128  ;;  %p219_p10 = scmp.lt.s32.totalorder %s130_s6, %s130_s6 }
  0x42   :  { %v81_v10 = vadd.f32 %v80_v5, %v77_v4  ;;  %v91_v11 = vmul.f32 %v90_v9, %v74_v1  ;;  %v98_v12 = vstv %s144_s25  ;;  %v101_v13 = vstv %s145_s26  ;;  %p215_p9 = scmp.ne.s32.totalorder %s130_s6, %s214_s7  ;;  %p220_p11 = scmp.lt.s32.totalorder %s214_s7, %s214_s7 }
  0x43   :  { %v99_v15 = vmul.f32 %v98_v12, %v72_v0  ;;  %v102_v16 = vmul.f32 %v101_v13, %v74_v1  ;;  %v105_v19 = vstv %s146_s1  ;;  %v109_v21 = vstv %s108_s0 }
  0x44   :  { %v84_v17 = vadd.f32 %v83_v7, %v81_v10  ;;  %v92_v18 = vadd.f32 %v91_v11, %v88_v8  ;;  %v112_v25 = vstv %s147_s4  ;;  %v116_v28 = vstv %s148_s27  ;;  %p221_p12 = por %p220_p11, %p219_p10 }
  0x45   :  { %v103_v20 = vadd.f32 %v102_v16, %v99_v15 }
  0x46   :  { %v85_v22 = vmax.f32 %v84_v17, 0.0  ;;  %v95_v23 = vadd.f32 %v94_v14, %v92_v18  ;;  %p222_p13 = pnand %p221_p12, %p215_p9 }
  0x47   :  { %v106_v24 = vadd.f32 %v105_v19, %v103_v20 }
  0x48   :  { %v96_v26 = vmax.f32 %v95_v23, 0.0  ;;  %v110_v27 = vmul.f32 %v109_v21, %v85_v22 }
  0x49   :  { %v107_v29 = vmax.f32 %v106_v24, 0.0 }
  0x4a   :  { %v113_v30 = vmul.f32 %v112_v25, %v96_v26 }
  0x4b   :  { %v117_v31 = vmul.f32 %v116_v28, %v107_v29 }
  0x4c   :  { %v114_v32 = vadd.f32 %v113_v30, %v110_v27 }
  0x4e   :  { %v118_v34 = vadd.f32 %v117_v31, %v114_v32 }
  0x50   :  { %v121_v35 = vadd.f32 %v120_v33, %v118_v34 }
  0x52   :  { %122 = vst [vmem:[#allocation11] sm:$0xff] %v121_v35 }
  0x53   :  { %225 = shalt.err (!%p222_p13)
}
  0x54   :  { %s226_s10 = scalar_lea.hbm %s322_s5, 128 }
  0x55   :  { %p227_p0 = scmp.ne.s32.totalorder %s322_s5, %s226_s10  ;;  %p230_p1 = scmp.lt.u32.totalorder %s226_s10, %s322_s5 }
  0x57   :  { %p232_p2 = pnand %p230_p1, %p227_p0 }
  0x59   :  { %235 = shalt.err (!%p232_p2)
}
  0x5a   :  { %132 = dma.vmem_to_hbm [thread:$0]  %s130_s6, 128, %s322_s5, [#allocation5]  }
  0x5b   :  { %242 = dma.done.wait [#allocation5], 128  }
  0x5c   :  { %243 = vsyncadd [#allocation5], 4294967168 }
  0x5d   :  { %136 = vsyncpa [#allocation4], 1 }
  0x5e   :  { %137 = vsyncpa [#allocation5], 1 }
  0x5f   :  { %138 = vsyncpa [#allocation6], 1 }
  0x60   :  { %139 = vsyncpa [#allocation8], 1 }

</bundles_post_ra>
